<compile_context>
chip_gen: v7x
topology: tpu7x:2x2x1
jax: 0.10.0
libtpu: 0.0.40
codegen_flags: <defaults>
</compile_context>

<pallas_src>
import jax
import jax.numpy as jnp
from jax.experimental import pallas as pl
from jax.experimental.pallas import tpu as pltpu

LANE = 128     # TPU lane width (last-dim tile)
_EPS = 1e-5    # BatchNorm2d default eps


def _round_up(x, m):
    return -(-x // m) * m


def _choose_tm(m_rows):
    """Largest M-tile (multiple of 128 rows) that still yields >=2 grid steps.

    Capped at 1024 rows: double-buffered (tm, K) bf16 patch blocks + (tm, 128) f32
    output blocks stay well under the 32 MiB scoped-VMEM default on every
    generation (v5e/v6e 128 MiB physical, v7x 64 MiB physical)."""
    for tm in (1024, 512, 256, 128):
        if m_rows >= 2 * tm:
            return tm
    return 128


# ---------------------------------------------------------------------------
# Pass 1: conv matmul -> per-tile partial sums for the BatchNorm statistics.
# ---------------------------------------------------------------------------
def _conv_stats_kernel(p_ref, w_ref, stats_ref):
    # p_ref: (tm, K) bf16, w_ref: (K, Cpad) bf16, stats_ref: (1, 8, Cpad) f32
    acc = jnp.dot(p_ref[...], w_ref[...], preferred_element_type=jnp.float32)
    s = jnp.sum(acc, axis=0, keepdims=True)           # per-channel sum      (1, Cpad)
    ss = jnp.sum(acc * acc, axis=0, keepdims=True)    # per-channel sum(x^2) (1, Cpad)
    row = jax.lax.broadcasted_iota(jnp.int32, (8, acc.shape[1]), 0)
    packed = jnp.where(row == 0, s, jnp.where(row == 1, ss, 0.0))
    stats_ref[...] = packed[None].astype(stats_ref.dtype)


# ---------------------------------------------------------------------------
# Pass 2: recompute conv matmul, apply fused BatchNorm scale/shift + ReLU.
# ---------------------------------------------------------------------------
def _conv_bn_relu_kernel(p_ref, w_ref, scale_ref, shift_ref, o_ref):
    acc = jnp.dot(p_ref[...], w_ref[...], preferred_element_type=jnp.float32)
    y = acc * scale_ref[...] + shift_ref[...]          # single FMA per element
    o_ref[...] = jnp.maximum(y, 0.0).astype(o_ref.dtype)


def conv_layer_forward(x_nchw, weight_khwcio, bias, gamma, beta):
    """ConvLayer forward (stride=1, padding=0, dilation=1, blocks=1,
    norm='batch norm' in training mode, act='relu').  weight: (KH, KW, Cin, Cout).

    `bias` is accepted for parity with nn.Conv2d(bias=True) but is mathematically
    cancelled by the BatchNorm mean subtraction, so it is unused."""
    del bias

    N, Cin, H, W = x_nchw.shape
    KH, KW, _, Cout = weight_khwcio.shape
    Ho, Wo = H - KH + 1, W - KW + 1
    M = N * Ho * Wo
    K = KH * KW * Cin

    # --- XLA glue: NCHW -> NHWC once at the boundary, im2col patches in bf16 ---
    x = jnp.transpose(x_nchw, (0, 2, 3, 1)).astype(jnp.bfloat16)
    patches = jnp.stack(
        [x[:, kh:kh + Ho, kw:kw + Wo, :] for kh in range(KH) for kw in range(KW)],
        axis=3,                                         # (N, Ho, Wo, KH*KW, Cin)
    ).reshape(M, K)

    tm = _choose_tm(M)
    m_pad = _round_up(M, tm)
    num_tiles = m_pad // tm
    c_pad = _round_up(Cout, LANE)

    if m_pad != M:  # zero rows -> exact-zero conv rows -> statistics unaffected
        patches = jnp.pad(patches, ((0, m_pad - M), (0, 0)))

    w2d = weight_khwcio.reshape(K, Cout).astype(jnp.bfloat16)
    w2d = jnp.pad(w2d, ((0, 0), (0, c_pad - Cout)))     # zero cols -> zero channels
    gamma_p = jnp.pad(gamma.astype(jnp.float32), (0, c_pad - Cout))
    beta_p = jnp.pad(beta.astype(jnp.float32), (0, c_pad - Cout))

    parallel = pltpu.CompilerParams(dimension_semantics=("parallel",))

    # --- pass 1: per-tile partial sums -----------------------------------------
    stats = pl.pallas_call(
        _conv_stats_kernel,
        out_shape=jax.ShapeDtypeStruct((num_tiles, 8, c_pad), jnp.float32),
        grid=(num_tiles,),
        in_specs=[
            pl.BlockSpec((tm, K), lambda i: (i, 0)),
            pl.BlockSpec((K, c_pad), lambda i: (0, 0)),   # weight resident across tiles
        ],
        out_specs=pl.BlockSpec((1, 8, c_pad), lambda i: (i, 0, 0)),
        compiler_params=parallel,
    )(patches, w2d)

    # --- finalize: fold batch stats + BN affine into per-channel scale/shift ---
    sum_c = jnp.sum(stats[:, 0, :], axis=0)
    ssq_c = jnp.sum(stats[:, 1, :], axis=0)
    mean = sum_c / M                                     # real-M divisor (pad rows are zero)
    var = jnp.maximum(ssq_c / M - mean * mean, 0.0)      # biased variance, as BN uses
    scale = gamma_p * jax.lax.rsqrt(var + _EPS)
    shift = beta_p - mean * scale
    scale2d = scale.reshape(1, c_pad)
    shift2d = shift.reshape(1, c_pad)

    # --- pass 2: apply scale/shift + ReLU (lane-dense, unmasked stores) --------
    out = pl.pallas_call(
        _conv_bn_relu_kernel,
        out_shape=jax.ShapeDtypeStruct((m_pad, c_pad), jnp.float32),
        grid=(num_tiles,),
        in_specs=[
            pl.BlockSpec((tm, K), lambda i: (i, 0)),
            pl.BlockSpec((K, c_pad), lambda i: (0, 0)),
            pl.BlockSpec((1, c_pad), lambda i: (0, 0)),
            pl.BlockSpec((1, c_pad), lambda i: (0, 0)),
        ],
        out_specs=pl.BlockSpec((tm, c_pad), lambda i: (i, 0)),
        compiler_params=parallel,
    )(patches, w2d, scale2d, shift2d)

    y = out[:M, :Cout].reshape(N, Ho, Wo, Cout)
    return jnp.transpose(y, (0, 3, 1, 2))                # back to NCHW at the boundary


def _reference_forward(x_nchw, weight_khwcio, bias, gamma, beta):
    """Pure-JAX f32 reference: Conv2d(+bias) -> BatchNorm2d(batch stats) -> ReLU."""
    w_oihw = jnp.transpose(weight_khwcio, (3, 2, 0, 1))
    out = jax.lax.conv_general_dilated(
        x_nchw, w_oihw, window_strides=(1, 1), padding="VALID",
        dimension_numbers=("NCHW", "OIHW", "NCHW"))
    out = out + bias.reshape(1, -1, 1, 1)
    mean = jnp.mean(out, axis=(0, 2, 3), keepdims=True)
    var = jnp.var(out, axis=(0, 2, 3), keepdims=True)    # biased
    out = (out - mean) * jax.lax.rsqrt(var + _EPS)
    out = out * gamma.reshape(1, -1, 1, 1) + beta.reshape(1, -1, 1, 1)
    return jnp.maximum(out, 0.0)


if __name__ == "__main__":
    key = jax.random.PRNGKey(0)
    N, Cin, H, W = 2, 4, 16, 16
    Cout, KH, KW = 8, 3, 3

    k1, k2, k3, k4 = jax.random.split(key, 4)
    x = jax.random.normal(k1, (N, Cin, H, W), jnp.float32)

    # deterministic parameter init mirroring ConvLayer.__init__ (init='kaiming'):
    fan_in = Cin * KH * KW
    kaiming_std = (2.0 / fan_in) ** 0.5                  # kaiming_normal_, a=0, fan_in
    weight = kaiming_std * jax.random.normal(k2, (KH, KW, Cin, Cout), jnp.float32)
    bound = 1.0 / fan_in ** 0.5                          # Conv2d default bias init
    bias = jax.random.uniform(k3, (Cout,), jnp.float32, minval=-bound, maxval=bound)
    gamma = 1.0 + 0.02 * jax.random.normal(k4, (Cout,), jnp.float32)  # BN weight ~ N(1, 0.02)
    beta = jnp.zeros((Cout,), jnp.float32)                            # BN bias = 0

    y = conv_layer_forward(x, weight, bias, gamma, beta)
    jax.block_until_ready(y)

    assert y.shape == (N, Cout, H - KH + 1, W - KW + 1)
    assert bool(jnp.all(jnp.isfinite(y)))

    # Loose tolerance: the kernel runs the matmul in bf16 (f32 accumulation).
    y_ref = _reference_forward(x, weight, bias, gamma, beta)
    assert bool(jnp.allclose(y, y_ref, atol=5e-2, rtol=5e-2)), (
        f"max abs err vs f32 reference: {float(jnp.max(jnp.abs(y - y_ref)))}")

    print("KERNEL_OK")
</pallas_src>

<mosaic_0001>
module attributes {stable_mosaic.version = 11 : i64} {
  func.func @_conv_stats_kernel(%arg0: i32, %arg1: memref<128x36xbf16, #tpu.memory_space<vmem>>, %arg2: memref<36x128xbf16, #tpu.memory_space<vmem>>, %arg3: memref<1x8x128xf32, #tpu.memory_space<vmem>>) attributes {dimension_semantics = [#tpu.dimension_semantics<parallel>], iteration_bounds = array<i64: 4>, scalar_prefetch = 0 : i64, scratch_operands = 0 : i64, tpu.core_type = #tpu.core_type<tc>, window_params = [{transform_indices = @transform_0, window_bounds = array<i64: 128, 36>}, {pipeline_mode = #tpu.pipeline_mode<synchronous>, transform_indices = @transform_1, window_bounds = array<i64: 36, 128>}, {transform_indices = @transform_2, window_bounds = array<i64: 1, 8, 128>}]} {
    %c0 = arith.constant 0 : index
    %c0_0 = arith.constant 0 : index
    %0 = vector.load %arg1[%c0, %c0_0] : memref<128x36xbf16, #tpu.memory_space<vmem>>, vector<128x36xbf16>
    %c0_1 = arith.constant 0 : index
    %c0_2 = arith.constant 0 : index
    %1 = vector.load %arg2[%c0_1, %c0_2] : memref<36x128xbf16, #tpu.memory_space<vmem>>, vector<36x128xbf16>
    %cst = arith.constant dense<0.000000e+00> : vector<128x128xf32>
    %2 = tpu.matmul %0, %1, %cst {dimension_numbers = #tpu.dot_dimension_numbers<[1], [0], [0], [1], [0, 0, 1, 1], [], []>} : vector<128x36xbf16>, vector<36x128xbf16>, vector<128x128xf32> -> vector<128x128xf32>
    %cst_3 = arith.constant dense<0.000000e+00> : vector<128xf32>
    %3 = vector.multi_reduction <add>, %2, %cst_3 [0] : vector<128x128xf32> to vector<128xf32>
    %4 = vector.shape_cast %3 : vector<128xf32> to vector<1x128xf32>
    %5 = arith.mulf %2, %2 : vector<128x128xf32>
    %cst_4 = arith.constant dense<0.000000e+00> : vector<128xf32>
    %6 = vector.multi_reduction <add>, %5, %cst_4 [0] : vector<128x128xf32> to vector<128xf32>
    %7 = vector.shape_cast %6 : vector<128xf32> to vector<1x128xf32>
    %8 = tpu.iota {dimensions = array<i32: 0>} : vector<8x128xi32>
    %c0_i32 = arith.constant 0 : i32
    %9 = vector.broadcast %c0_i32 : i32 to vector<8x128xi32>
    %10 = arith.cmpi eq, %8, %9 : vector<8x128xi32>
    %c1_i32 = arith.constant 1 : i32
    %11 = vector.broadcast %c1_i32 : i32 to vector<8x128xi32>
    %12 = arith.cmpi eq, %8, %11 : vector<8x128xi32>
    %cst_5 = arith.constant 0.000000e+00 : f32
    %13 = vector.shape_cast %7 : vector<1x128xf32> to vector<1x128xf32>
    %14 = vector.broadcast %13 : vector<1x128xf32> to vector<8x128xf32>
    %15 = vector.broadcast %cst_5 : f32 to vector<8x128xf32>
    %16 = arith.select %12, %14, %15 : vector<8x128xi1>, vector<8x128xf32>
    %17 = vector.shape_cast %4 : vector<1x128xf32> to vector<1x128xf32>
    %18 = vector.broadcast %17 : vector<1x128xf32> to vector<8x128xf32>
    %19 = arith.select %10, %18, %16 : vector<8x128xi1>, vector<8x128xf32>
    %20 = vector.shape_cast %19 : vector<8x128xf32> to vector<1x8x128xf32>
    %c0_6 = arith.constant 0 : index
    %c0_7 = arith.constant 0 : index
    %c0_8 = arith.constant 0 : index
    %21 = vector.load %arg3[%c0_6, %c0_7, %c0_8] : memref<1x8x128xf32, #tpu.memory_space<vmem>>, vector<1x8x128xf32>
    tpu.vector_store %arg3[%c0_6, %c0_7, %c0_8], %20 {strides = array<i32>} : memref<1x8x128xf32, #tpu.memory_space<vmem>>, vector<1x8x128xf32>,
    return
  }
  func.func @transform_0(%arg0: i32) -> (i32, i32) {
    %c0_i32 = arith.constant 0 : i32
    %c0_i32_0 = arith.constant 0 : i32
    return %arg0, %c0_i32 : i32, i32
  }
  func.func @transform_1(%arg0: i32) -> (i32, i32) {
    %c0_i32 = arith.constant 0 : i32
    %c0_i32_0 = arith.constant 0 : i32
    %c0_i32_1 = arith.constant 0 : i32
    return %c0_i32, %c0_i32_0 : i32, i32
  }
  func.func @transform_2(%arg0: i32) -> (i32, i32, i32) {
    %c0_i32 = arith.constant 0 : i32
    %c0_i32_0 = arith.constant 0 : i32
    %c0_i32_1 = arith.constant 0 : i32
    return %arg0, %c0_i32, %c0_i32_0 : i32, i32, i32
  }
}

</mosaic_0001>

<bundles_post_ra>
// kernel: tpu_custom_call.1
= control target key start
LH: loop header
LB: loop body
LE: loop exit
PB: predicated region body
PF: predicated region fallthrough
CT: control target
= control target key end

     0   :  { %7 = vsyncpa [#allocation3], 0  ;;  %s802_s0 = inlined_call_operand.vmem [shape: bf16[512,36], index: 0, kind: input, shape index: {}]   ;;  %s803_s1 = inlined_call_operand.vmem [shape: bf16[36,128], index: 1, kind: input, shape index: {}]   ;;  %s804_s2 = inlined_call_operand.hbm [shape: f32[4,8,128], index: 2, kind: output, shape index: {}]  }
   0x1   :  { %9 = vsyncpa [#allocation3 + $0x1], 0  ;;  %s686_s9 = smov 0   ;;  %s688_s10 = smov 0  }
   0x2   :  { %s690_s11 = smov 0   ;;  %s692_s12 = smov 0  }
   0x3 LB: > { %s707_s13 = sadd.s32 4294967295, %s668_s12   ;;  %s485_s14 = sadd.s32 4294967294, %s668_s12   ;;  %s668_s12 = sphi %s692_s12, %s810_s12   ;;  %s664_s11 = sphi %s690_s11, %s809_s11   ;;  %s660_s10 = sphi %s688_s10, %s808_s10   ;;  %s656_s9 = sphi %s686_s9, %s807_s9  }
   0x4   : > { %s711_s15 = sadd.s32 1, %s668_s12   ;;  %s69_s16 = sadd.s32 1, %s664_s11 }
   0x5   : > { %s66_s17 = ssub.s32 %s668_s12, %s711_s15  ;;  %p79_p0 = scmp.ne.s32.totalorder %s664_s11, %s660_s10 }
   0x6   : > { %p67_p1 = scmp.eq.s32.totalorder %s66_s17, 0  ;;  %p80_p2 = scmp.eq.s32.totalorder %s707_s13, 3 }
   0x7   : > { %p85_p3 = scmp.ne.s32.totalorder %s660_s10, %s656_s9  ;;  %p86_p4 = scmp.eq.s32.totalorder %s485_s14, 3 }
   0x8   : > { %s722_s18 = scalar_select %p67_p1, %s664_s11, %s69_s16  }
   0x9   : > { %p724_p5 = por %p80_p2, %p79_p0  ;;  %p728_p6 = por %p86_p4, %p85_p3 }
   0xa   : > { %p488_p7 = scmp.ge.s32.totalorder %s668_s12, 1  ;;  %p116_p8 = scmp.lt.s32.totalorder %s668_s12, 5 }
   0xc   : > { %p117_p9 = pnand %p488_p7, %p116_p8 }
   0xd   : > { %v595_v0 = vld [vmem:[%s803_s1] sm:$0xff] (!%p117_p9)   ;;  %v596_v1 = vld [vmem:[%s803_s1 + $0x8] sm:$0xff] (!%p117_p9)   ;;  %s490_s25 = sshll.u32 (!%p117_p9), %s707_s13, 4  ;;  %v597_v2 = vld [vmem:[%s803_s1 + $0x10] ss:$0 sps:$4 sm:$0x33] (!%p117_p9)  }
   0xe   : > { %120 = sbr.rel (%p117_p9) target bundleno = 301 (0x12d), region = 28  ;;  %526 = vmatprep.subr.bf16.mxu0 (!%p117_p9), %v595_v0  ;;  %p139_p10 = scmp.lt.s32.totalorder (!%p117_p9), %s490_s25, 63  ;;  %548 = vmatprep.subr.bf16.mxu1 (!%p117_p9), %v595_v0  ;;  %vm246_vm0 = vcmask (!%p117_p9), 1041408   ;;  %vm221_vm1 = vcmask (!%p117_p9), 293888  }
   0xf   : > { %527 = vmatpush3.bf16.msra.mxu0 (!%p117_p9), %v595_v0  ;;  %551 = vmatpush3.bf16.msra.mxu1 (!%p117_p9), %v595_v0  ;;  %v248_v3 = vsel (!%p117_p9), %vm246_vm0, %v597_v2, 0  ;;  %s135_s4 = sand.u32 (!%p117_p9), 1, %s660_s10   ;;  %s512_s6 = sshll.u32 (!%p117_p9), %s707_s13, 7 }
  0x10   : > { %528 = vmatprep.subr.bf16.mxu0 (!%p117_p9), %v596_v1  ;;  %549 = vmatprep.subr.bf16.mxu1 (!%p117_p9), %v596_v1  ;;  %s489_s5 = sshll.u32 (!%p117_p9), %s135_s4, 3  ;;  %s760_s17 = scalar_lea.hbm (!%p117_p9), %s804_s2, %s512_s6 }
  0x11   : > { %s137_s7 = scalar_lea.vmem (!%p117_p9), [#allocation2], %s489_s5  ;;  %s413_s21 = scalar_lea.sflag (!%p117_p9), [#allocation3], %s135_s4 }
  0x12   : > { %s426_s8 = sshll.u32 (!%p117_p9), %s137_s7, 4  ;;  %s670_s22 = smov (!%p117_p9), [#allocation2]   ;;  %s762_s8 = int_to_ptr.vmem [resolvable:$true] %s426_s8 }
  0x13   : > { %529 = vmatpush3.bf16.msra.mxu0 (!%p117_p9), %v596_v1  ;;  %552 = vmatpush3.bf16.msra.mxu1 (!%p117_p9), %v596_v1  ;;  %s606_s13 = scalar_lea.vmem (!%p117_p9), %s762_s8, 128  ;;  %s610_s23 = sshll.u32 (!%p117_p9), %s670_s22, 4  ;;  %s611_s23 = int_to_ptr.vmem [resolvable:$false] %s610_s23 }
  0x14   : > { %554 = vmatprep.subr.msk.bf16.mxu0 (!%p117_p9), %vm246_vm0, %v597_v2  ;;  %555 = vmatprep.subr.msk.bf16.mxu1 (!%p117_p9), %vm246_vm0, %v597_v2  ;;  %p607_p11 = scmp.ne.s32.totalorder (!%p117_p9), %s762_s8, %s606_s13  ;;  %s612_s24 = scalar_lea.vmem (!%p117_p9), %s611_s23, 256 }
  0x15   : > { %s812_s25 = smov (!%p139_p10, %s490_s25), 63  ;;  %p613_p0 = scmp.lt.s32.totalorder %s762_s8, %s611_s23 }
  0x16   : > { %s491_s28 = sshll.u32 %s812_s25, 2  ;;  %p608_p12 = pnand %p607_p11, %p724_p5 }
  0x17   : > { %s142_s3 = scalar_lea.vmem %s802_s0, %s491_s28  ;;  %531 = vmatpush3.bf16.msra.mxu0 %v248_v3  ;;  %553 = vmatpush3.bf16.msra.mxu1 %v248_v3  ;;  %p614_p1 = scmp.lt.s32.totalorder %s612_s24, %s606_s13 }
  0x18   : > { %v598_v4 = vld [vmem:[%s142_s3] sm:$0xff]   ;;  %v599_v5 = vld [vmem:[%s142_s3 + $0x8] sm:$0xff]   ;;  %v600_v6 = vld [vmem:[%s142_s3 + $0x10] sm:$0xff]   ;;  %p609_p13 = pneg %p608_p12 }
  0x19   : > { %532 = vmatprep.mubr.msk.bf16.mxu0 %vm221_vm1, %v598_v4  ;;  %v602_v7 = vld [vmem:[%s142_s3 + $0x20] sm:$0xff]   ;;  %v603_v8 = vld [vmem:[%s142_s3 + $0x28] sm:$0xff]   ;;  %v604_v9 = vld [vmem:[%s142_s3 + $0x30] sm:$0xff]   ;;  %p615_p2 = por %p614_p1, %p613_p0 }
  0x1a   : > { %533 = vmatmul.mubr.msk.bf16.vlgmr.msra.gmra.mrb[0].mxu0 %vm221_vm1, %v599_v5  ;;  %540 = vmatprep.mubr.msk.bf16.mxu1 %vm221_vm1, %v602_v7  ;;  %v601_v10 = vld [vmem:[%s142_s3 + $0x18] sm:$0xff]  }
  0x1b   : > { %536 = vmatprep.mubr.msk.bf16.mxu0 %vm221_vm1, %v600_v6  ;;  %541 = vmatmul.mubr.msk.bf16.vlgmr.msra.gmra.mrb[0].mxu1 %vm221_vm1, %v603_v8  ;;  %v605_v11 = vld [vmem:[%s142_s3 + $0x38] sm:$0xff]   ;;  %p616_p3 = pnand %p615_p2, %p609_p13 }
  0x1c   : > { %544 = vmatprep.mubr.msk.bf16.mxu1 %vm221_vm1, %v604_v9 }
  0x22   : > { %537 = vmatmul.mubr.msk.bf16.gmra.mrb[4].mxu0 %vm221_vm1, %v601_v10 }
  0x23   : > { %545 = vmatmul.mubr.msk.bf16.gmra.mrb[4].mxu1 %vm221_vm1, %v605_v11 }
  0xed   : > { %v534_v12 = vpop.f32.mrb[0].mxu0 }
  0xee   : > { %v284_v13 = vpop.f32.mrb[1].mxu0  ;;  %v542_v14 = vpop.f32.mrb[0].mxu1  ;;  %v370_v23 = vmul.f32 %v534_v12, %v534_v12 }
  0xef   : > { %v535_v15 = vpop.f32.mrb[2].mxu0  ;;  %v316_v16 = vpop.f32.mrb[1].mxu1  ;;  %v368_v19 = vmul.f32 %v284_v13, %v284_v13  ;;  %v378_v55 = vmul.f32 %v542_v14, %v542_v14 }
  0xf0   : > { %v287_v17 = vpop.f32.mrb[3].mxu0  ;;  %v543_v18 = vpop.f32.mrb[2].mxu1  ;;  %v371_v26 = vmul.f32 %v535_v15, %v535_v15  ;;  %v376_v49 = vmul.f32 %v316_v16, %v316_v16 }
  0xf1   : > { %v347_v20 = vadd.f32 %v287_v17, %v284_v13  ;;  %v369_v21 = vmul.f32 %v287_v17, %v287_v17  ;;  %v319_v22 = vpop.f32.mrb[3].mxu1  ;;  %v379_v58 = vmul.f32 %v543_v18, %v543_v18  ;;  %v405_v13 = vlaneseq }
  0xf2   : > { %v377_v54 = vmul.f32 %v319_v22, %v319_v22 }
  0xf3   : > { %v348_v24 = vadd.f32 %v534_v12, %v347_v20  ;;  %v384_v25 = vadd.f32 %v369_v21, %v368_v19 }
  0xf5   : > { %v385_v27 = vadd.f32 %v384_v25, %v370_v23  ;;  %v538_v28 = vpop.f32.mrb[4].mxu0  ;;  %v349_v29 = vadd.f32 %v535_v15, %v348_v24 }
  0xf6   : > { %v300_v30 = vpop.f32.mrb[5].mxu0  ;;  %v546_v31 = vpop.f32.mrb[4].mxu1  ;;  %v374_v43 = vmul.f32 %v538_v28, %v538_v28 }
  0xf7   : > { %v350_v32 = vadd.f32 %v349_v29, %v300_v30  ;;  %v372_v33 = vmul.f32 %v300_v30, %v300_v30  ;;  %v386_v34 = vadd.f32 %v385_v27, %v371_v26  ;;  %v539_v35 = vpop.f32.mrb[6].mxu0  ;;  %v332_v36 = vpop.f32.mrb[5].mxu1  ;;  %v382_v3 = vmul.f32 %v546_v31, %v546_v31 }
  0xf8   : > { %v303_v37 = vpop.f32.mrb[7].mxu0  ;;  %v547_v38 = vpop.f32.mrb[6].mxu1  ;;  %v375_v46 = vmul.f32 %v539_v35, %v539_v35  ;;  %v380_v61 = vmul.f32 %v332_v36, %v332_v36 }
  0xf9   : > { %v387_v39 = vadd.f32 %v386_v34, %v372_v33  ;;  %v351_v40 = vadd.f32 %v350_v32, %v303_v37  ;;  %v373_v41 = vmul.f32 %v303_v37, %v303_v37  ;;  %v335_v42 = vpop.f32.mrb[7].mxu1  ;;  %v383_v6 = vmul.f32 %v547_v38, %v547_v38 }
  0xfa   : > { %v381_v2 = vmul.f32 %v335_v42, %v335_v42 }
  0xfb   : > { %v352_v44 = vadd.f32 %v538_v28, %v351_v40  ;;  %v388_v45 = vadd.f32 %v387_v39, %v373_v41 }
  0xfd   : > { %v389_v47 = vadd.f32 %v388_v45, %v374_v43  ;;  %v353_v48 = vadd.f32 %v539_v35, %v352_v44 }
  0xff   : > { %v354_v50 = vadd.f32 %v353_v48, %v316_v16  ;;  %v390_v51 = vadd.f32 %v389_v47, %v375_v46 }
 0x101   : > { %v391_v52 = vadd.f32 %v390_v51, %v376_v49  ;;  %v355_v53 = vadd.f32 %v354_v50, %v319_v22 }
 0x103   : > { %v356_v56 = vadd.f32 %v542_v14, %v355_v53  ;;  %v392_v57 = vadd.f32 %v391_v52, %v377_v54 }
 0x105   : > { %v393_v59 = vadd.f32 %v392_v57, %v378_v55  ;;  %v357_v60 = vadd.f32 %v543_v18, %v356_v56  ;;  %v406_v18 = vshrl.u32 %v405_v13, 7 }
 0x107   : > { %v358_v62 = vadd.f32 %v357_v60, %v332_v36  ;;  %v394_v63 = vadd.f32 %v393_v59, %v379_v58  ;;  %vm408_vm2 = vcmp.eq.s32.totalorder %v406_v18, 1  ;;  %vm407_vm3 = vcmp.eq.s32.totalorder %v406_v18, 0 }
 0x109   : > { %v395_v0 = vadd.f32 %v394_v63, %v380_v61  ;;  %v359_v1 = vadd.f32 %v358_v62, %v335_v42 }
 0x10b   : > { %v360_v4 = vadd.f32 %v546_v31, %v359_v1  ;;  %v396_v5 = vadd.f32 %v395_v0, %v381_v2 }
 0x10d   : > { %v361_v7 = vadd.f32 %v547_v38, %v360_v4  ;;  %v397_v8 = vadd.f32 %v396_v5, %v382_v3 }
 0x10f   : > { %v362_v9 = vrot.slane %v361_v7, 4  ;;  %v398_v10 = vadd.f32 %v397_v8, %v383_v6 }
 0x111   : > { %v363_v11 = vadd.f32 %v362_v9, %v361_v7  ;;  %v399_v12 = vrot.slane %v398_v10, 4 }
 0x113   : > { %v364_v14 = vrot.slane %v363_v11, 2  ;;  %v400_v15 = vadd.f32 %v399_v12, %v398_v10 }
 0x115   : > { %v365_v16 = vadd.f32 %v364_v14, %v363_v11  ;;  %v401_v17 = vrot.slane %v400_v15, 2 }
 0x117   : > { %v402_v19 = vadd.f32 %v401_v17, %v400_v15  ;;  %v366_v20 = vrot.slane %v365_v16, 1 }
 0x119   : > { %v403_v21 = vrot.slane %v402_v19, 1  ;;  %v367_v23 = vadd.f32 %v366_v20, %v365_v16 }
 0x11b   : > { %v404_v22 = vadd.f32 %v403_v21, %v402_v19 }
 0x11d   : > { %v409_v24 = vsel %vm408_vm2, %v404_v22, 0.0 }
 0x11e   : > { %v410_v25 = vsel %vm407_vm3, %v367_v23, %v409_v24 }
 0x11f   : > { %411 = vst [vmem:[%s137_s7] sm:$0xff] %v410_v25 }
 0x120   : > { %619 = shalt.err (!%p616_p3)
}
 0x121   : > { %s620_s25 = scalar_lea.hbm %s760_s17, 128  ;;  %s624_s28 = scalar_lea.hbm %s804_s2, 512 }
 0x122   : > { %p621_p4 = scmp.ne.s32.totalorder %s760_s17, %s620_s25  ;;  %p625_p9 = scmp.lt.u32.totalorder %s760_s17, %s804_s2 }
 0x123   : > { %p626_p10 = scmp.lt.u32.totalorder %s624_s28, %s620_s25  ;;  %p628_p12 = scmp.lt.u32.totalorder %s620_s25, %s760_s17 }
 0x124   : > { %p622_p7 = pnand %p621_p4, %p724_p5 }
 0x125   : > { %p627_p11 = por %p626_p10, %p625_p9 }
 0x126   : > { %p623_p8 = pneg %p622_p7 }
 0x127   : > { %p629_p13 = por %p628_p12, %p627_p11 }
 0x129   : > { %p630_p0 = pnand %p629_p13, %p623_p8 }
 0x12b   : > { %633 = shalt.err (!%p630_p0)
}
 0x12c   : > { %556 = dma.vmem_to_hbm [thread:$0]  (%p724_p5), %s762_s8, 128, %s760_s17, %s413_s21  }
 0x12d PF: > { %p562_p1 = scmp.ge.s32.totalorder %s668_s12, 2  ;;  %s438_s3 = sand.u32 1, %s656_s9  }
 0x12e   : > { %s439_s4 = scalar_lea.sflag [#allocation3], %s438_s3 }
 0x12f   : > { %p559_p2 = pnand %p562_p1, %p728_p6 }
 0x131   : > { %651 = dma.done.wait (!%p559_p2), %s439_s4, 128  }
 0x132   : > { %653 = vsyncadd (!%p559_p2), %s439_s4, 4294967168  ;;  %p12_p3 = scmp.ge.s32.totalorder %s711_s15, 6   ;;  %s807_s9 = smov %s660_s10 }
 0x133   : > { %s808_s10 = smov %s664_s11  ;;  %s809_s11 = smov %s722_s18 }
 0x134   : > { %s810_s12 = smov %s711_s15  ;;  %14 = sbr.rel (!%p12_p3) target bundleno = 3 (0x3), region = 63 }
 0x13b   :  { %444 = vsyncpa [#allocation3], 1 }
 0x13c   :  { %446 = vsyncpa [#allocation3 + $0x1], 1 }

</bundles_post_ra>
